<compile_context>
chip_gen: v7x
topology: tpu7x:2x2x1
jax: 0.10.0
libtpu: 0.0.40
codegen_flags: <defaults>
</compile_context>

<pallas_src>
import math
import functools

import jax
import jax.numpy as jnp
from jax.experimental import pallas as pl
from jax.experimental.pallas import tpu as pltpu


def _hgnn_fused_kernel(c1s_ref, x_ref, ht_ref, htT_ref,
                       wx1_ref, we1_ref, wx2_ref, we2_ref,
                       w1_ref, b_ref,
                       node_out_ref, edge_att_ref, *, alpha):
    Bt, N, D = x_ref.shape
    F = w1_ref.shape[1]
    neg_inf = -9e15  # masked-softmax trick; an all-zero incidence row degenerates to uniform.

    def hgat(x_in_bf, xt_bf, wx_ref, we_ref, c1, exact_edge_norm):
        # x_in_bf : (Bt, N, Din) bf16  features used for the attention scores
        # xt_bf   : (Bt, N, F)   bf16  features aggregated into hyperedges
        # wx_ref  : (2, Din) f32       rows = [w2 @ a1_x, w2 @ a2_x]  (folded score weights)
        # we_ref  : (1, F)   f32       (w3 @ a2_e)^T
        # c1      : f32 scalar         ctx . a1[:F]
        x_f32 = x_in_bf.astype(jnp.float32)
        # Folded score projections on the VPU (broadcast-multiply + lane reduce) instead of a
        # 2-column MXU matmul: frees the MXU slot for the aggregation / transfer matmuls.
        s1 = jnp.sum(x_f32 * wx_ref[0:1, :][None], axis=-1, keepdims=True) + c1   # (Bt, N, 1)
        s2lin = jnp.sum(x_f32 * wx_ref[1:2, :][None], axis=-1, keepdims=True)     # (Bt, N, 1)

        # ---- stage 1: node -> hyperedge attention (masked softmax over nodes) ----
        s1 = jnp.where(s1 > 0, s1, alpha * s1)                          # LeakyReLU
        s1t = jnp.swapaxes(s1, 1, 2)                                    # (Bt, 1, N)
        ht_mask = ht_ref[...].astype(jnp.float32) > 0                   # (Bt, E, N) int8 -> bool
        scores1 = jnp.where(ht_mask, s1t, neg_inf)                      # (Bt, E, N)
        p1 = jnp.exp(scores1 - jnp.max(scores1, axis=-1, keepdims=True))
        denom1 = jnp.sum(p1, axis=-1, keepdims=True)
        if exact_edge_norm:
            att_edge = p1 / denom1                                      # exact: this one is returned
        else:
            att_edge = p1 * pl.reciprocal(denom1, approx=True)          # EUP slot, otherwise idle
        edge = jnp.einsum('ben,bnf->bef', att_edge.astype(jnp.bfloat16), xt_bf,
                          preferred_element_type=jnp.float32)           # (Bt, E, F)

        # ---- stage 2: hyperedge -> node attention (masked softmax over edges) ----
        se = jnp.sum(edge * we_ref[...][None], axis=-1, keepdims=True)  # (Bt, E, 1) VPU + lane reduce
        s2 = s2lin + jnp.swapaxes(se, 1, 2)                             # (Bt, N, E)
        s2 = jnp.where(s2 > 0, s2, alpha * s2)                          # LeakyReLU
        htT_mask = htT_ref[...].astype(jnp.float32) > 0                 # (Bt, N, E)
        scores2 = jnp.where(htT_mask, s2, neg_inf)
        p2 = jnp.exp(scores2 - jnp.max(scores2, axis=-1, keepdims=True))
        att_node = p2 * pl.reciprocal(jnp.sum(p2, axis=-1, keepdims=True), approx=True)
        node = jnp.einsum('bne,bef->bnf', att_node.astype(jnp.bfloat16),
                          edge.astype(jnp.bfloat16),
                          preferred_element_type=jnp.float32)           # (Bt, N, F)
        return node, att_edge

    x_bf = x_ref[...]                                                   # (Bt, N, D) bf16

    # ---- layer 1: transfer=False (xt = x), concat=True (ELU); attention never leaves VMEM ----
    node1, _ = hgat(x_bf, x_bf, wx1_ref, we1_ref, c1s_ref[0], exact_edge_norm=False)
    node1 = jnp.where(node1 > 0, node1, jnp.exp(jnp.minimum(node1, 0.0)) - 1.0)   # ELU
    x1_bf = node1.astype(jnp.bfloat16)
    # F.dropout between layers: identity in eval mode.

    # ---- layer 2: transfer=True (xt = x @ W1 + b), concat=False ----
    # (Bt, N, F) -> (Bt*N, F) is a free layout view as long as N is a multiple of 16 (bf16 sublanes).
    xt2 = jnp.dot(x1_bf.reshape(Bt * N, F), w1_ref[...],
                  preferred_element_type=jnp.float32) + b_ref[...]
    xt2_bf = xt2.reshape(Bt, N, F).astype(jnp.bfloat16)
    node2, att_edge2 = hgat(x1_bf, xt2_bf, wx2_ref, we2_ref, c1s_ref[1], exact_edge_norm=True)

    node_out_ref[...] = node2.astype(node_out_ref.dtype)
    edge_att_ref[...] = att_edge2.astype(edge_att_ref.dtype)


def _pack_layer(p):
    """Fold the attention vectors into the weight matrices (done once, in XLA)."""
    F = p["w2"].shape[1]
    wx = jnp.stack([jnp.dot(p["w2"], p["a1"][F:]),
                    jnp.dot(p["w2"], p["a2"][:F])], axis=0).astype(jnp.float32)   # (2, Din)
    we = jnp.dot(p["w3"], p["a2"][F:]).reshape(1, F).astype(jnp.float32)          # (1, F)
    c1 = jnp.dot(p["ctx"], p["a1"][:F]).astype(jnp.float32)                       # scalar
    return wx, we, c1


def _choose_block_b(B, N, E, D, F, out_itemsize, vmem_limit_bytes):
    """Pick the batch block from a VMEM budget; prefer an even, >=2-step grid (v7x megacore)."""
    in_b = 2 * N * D + E * N + N * E                              # bf16 nodes + int8 HT + int8 HT^T
    out_b = out_itemsize * (N * F + E * N)                        # node_out + edge_att
    f32_tmp = 4 * (6 * E * N + 2 * E * F + 4 * N * F + 2 * N * D)  # scores/p/att/edge/x1/xt2 slabs
    per_elem = 2 * (in_b + out_b) + f32_tmp                       # x2: double-buffered pipeline I/O
    budget = int(0.6 * vmem_limit_bytes)
    max_bb = max(1, budget // max(per_elem, 1))
    want = min(max_bb, max(1, B // 2))                            # keep >= 2 grid steps
    divisors = [d for d in range(1, B + 1) if B % d == 0 and d <= want] or [1]
    even = [d for d in divisors if (B // d) % 2 == 0]             # even grid shards 1:1 on v7x
    return max(even) if even else max(divisors)


def hgnn_forward(params, nodes_embedding, HT, *, alpha=0.2, block_b=None,
                 out_dtype=jnp.bfloat16):
    """HGNN.forward: returns (hypergraph_embedding, edge_att)."""
    B, N, Din = nodes_embedding.shape
    E = HT.shape[1]
    F = params["layer2"]["w1"].shape[1]
    assert Din == F, "transfer=False layer1 requires input feature dim == hidden size"

    # Per-chip VMEM budget (v5e/v6e: 128 MiB physical, v7x: 64 MiB); leave headroom.
    try:
        vmem_cap = int(pltpu.get_tpu_info().vmem_capacity_bytes)
    except Exception:
        vmem_cap = 64 * 1024 * 1024
    vmem_limit = min(int(0.75 * vmem_cap), 100 * 1024 * 1024)

    out_itemsize = jnp.dtype(out_dtype).itemsize
    if block_b is None:
        block_b = _choose_block_b(B, N, E, Din, F, out_itemsize, vmem_limit)
    assert B % block_b == 0
    grid = (B // block_b,)

    wx1, we1, c11 = _pack_layer(params["layer1"])
    wx2, we2, c12 = _pack_layer(params["layer2"])
    c1s = jnp.stack([c11, c12]).astype(jnp.float32)               # (2,) -> SMEM
    w1 = params["layer2"]["w1"].astype(jnp.bfloat16)
    b = params["layer2"]["b"].reshape(1, F).astype(jnp.float32)

    nodes_bf = nodes_embedding.astype(jnp.bfloat16)
    ht_i8 = (HT != 0).astype(jnp.int8)                            # incidence as int8 0/1 mask
    htT_i8 = jnp.swapaxes(ht_i8, 1, 2)                            # transpose once, in XLA

    kernel = functools.partial(_hgnn_fused_kernel, alpha=alpha)

    def full(shape):
        return pl.BlockSpec(shape, lambda i: (0,) * len(shape))

    flops = int(B * (4 * E * N * F + 4 * N * E * F + 2 * N * F * F))
    transcendentals = int(B * (4 * E * N + N * F))
    bytes_accessed = int(B * (2 * N * Din + 2 * E * N)
                         + B * out_itemsize * (N * F + E * N)
                         + 4 * (4 * Din + 2 * F + F * F + F) + 8)

    node_out, edge_att = pl.pallas_call(
        kernel,
        out_shape=(jax.ShapeDtypeStruct((B, N, F), out_dtype),
                   jax.ShapeDtypeStruct((B, E, N), out_dtype)),
        grid=grid,
        in_specs=[
            pl.BlockSpec(memory_space=pltpu.MemorySpace.SMEM),        # per-layer ctx scalars
            pl.BlockSpec((block_b, N, Din), lambda i: (i, 0, 0)),     # nodes (bf16)
            pl.BlockSpec((block_b, E, N), lambda i: (i, 0, 0)),       # HT    (int8 mask)
            pl.BlockSpec((block_b, N, E), lambda i: (i, 0, 0)),       # HT^T  (int8 mask)
            full((2, Din)),                                           # layer1 folded score weights
            full((1, F)),                                             # layer1 (w3 @ a2e)^T
            full((2, F)),                                             # layer2 folded score weights
            full((1, F)),                                             # layer2 (w3 @ a2e)^T
            full((F, F)),                                             # layer2 W1 (transfer)
            full((1, F)),                                             # layer2 bias
        ],
        out_specs=(
            pl.BlockSpec((block_b, N, F), lambda i: (i, 0, 0)),
            pl.BlockSpec((block_b, E, N), lambda i: (i, 0, 0)),
        ),
        compiler_params=pltpu.CompilerParams(
            dimension_semantics=("parallel",),
            vmem_limit_bytes=vmem_limit),
        cost_estimate=pl.CostEstimate(flops=flops,
                                      transcendentals=transcendentals,
                                      bytes_accessed=bytes_accessed),
    )(c1s, nodes_bf, ht_i8, htT_i8, wx1, we1, wx2, we2, w1, b)
    return node_out, edge_att


def _uniform(key, shape, stdv):
    return jax.random.uniform(key, shape, jnp.float32, minval=-stdv, maxval=stdv)


def init_hgnn_params(key, hidden):
    # reset_parameters(): every weight ~ U(-1/sqrt(hidden), 1/sqrt(hidden))
    stdv = 1.0 / math.sqrt(hidden)

    def layer(k, din, dout):
        ks = jax.random.split(k, 7)
        return dict(
            w1=_uniform(ks[0], (din, dout), stdv),
            b=_uniform(ks[1], (dout,), stdv),
            w2=_uniform(ks[2], (din, dout), stdv),
            w3=_uniform(ks[3], (dout, dout), stdv),
            ctx=_uniform(ks[4], (dout,), stdv),
            a1=_uniform(ks[5], (2 * dout,), stdv),
            a2=_uniform(ks[6], (2 * dout,), stdv),
        )

    k1, k2 = jax.random.split(key)
    # HGNN_ATT(initial_feature, initial_feature, hidden_size); initial_feature == hidden_size.
    return dict(layer1=layer(k1, hidden, hidden), layer2=layer(k2, hidden, hidden))


if __name__ == "__main__":
    B, N, E, hidden = 2, 16, 8, 32          # batch, nodes, hyperedges, hiddenSize
    key = jax.random.PRNGKey(0)
    kp, kn, kh = jax.random.split(key, 3)

    params = init_hgnn_params(kp, hidden)
    nodes = jax.random.normal(kn, (B, N, hidden), jnp.float32)
    HT = (jax.random.uniform(kh, (B, E, N)) < 0.4).astype(jnp.float32)

    hg, edge_att = jax.jit(hgnn_forward)(params, nodes, HT)
    jax.block_until_ready((hg, edge_att))

    assert hg.shape == (B, N, hidden)
    assert edge_att.shape == (B, E, N)
    assert bool(jnp.all(jnp.isfinite(hg.astype(jnp.float32))))
    assert bool(jnp.all(jnp.isfinite(edge_att.astype(jnp.float32))))
    print("KERNEL_OK")
</pallas_src>

<mosaic_0001>
module attributes {stable_mosaic.version = 11 : i64} {
  func.func @_hgnn_fused_kernel(%arg0: i32, %arg1: memref<2xf32, #tpu.memory_space<smem>>, %arg2: memref<1x16x32xbf16, #tpu.memory_space<vmem>>, %arg3: memref<1x8x16xi8, #tpu.memory_space<vmem>>, %arg4: memref<1x16x8xi8, #tpu.memory_space<vmem>>, %arg5: memref<2x32xf32, #tpu.memory_space<vmem>>, %arg6: memref<1x32xf32, #tpu.memory_space<vmem>>, %arg7: memref<2x32xf32, #tpu.memory_space<vmem>>, %arg8: memref<1x32xf32, #tpu.memory_space<vmem>>, %arg9: memref<32x32xbf16, #tpu.memory_space<vmem>>, %arg10: memref<1x32xf32, #tpu.memory_space<vmem>>, %arg11: memref<1x16x32xbf16, #tpu.memory_space<vmem>>, %arg12: memref<1x8x16xbf16, #tpu.memory_space<vmem>>) attributes {dimension_semantics = [#tpu.dimension_semantics<parallel>], iteration_bounds = array<i64: 2>, scalar_prefetch = 0 : i64, scratch_operands = 0 : i64, tpu.core_type = #tpu.core_type<tc>, window_params = [{transform_indices = @transform_0, window_bounds = array<i64: 2>}, {transform_indices = @transform_1, window_bounds = array<i64: 1, 16, 32>}, {transform_indices = @transform_2, window_bounds = array<i64: 1, 8, 16>}, {transform_indices = @transform_3, window_bounds = array<i64: 1, 16, 8>}, {pipeline_mode = #tpu.pipeline_mode<synchronous>, transform_indices = @transform_4, window_bounds = array<i64: 2, 32>}, {pipeline_mode = #tpu.pipeline_mode<synchronous>, transform_indices = @transform_5, window_bounds = array<i64: 1, 32>}, {pipeline_mode = #tpu.pipeline_mode<synchronous>, transform_indices = @transform_6, window_bounds = array<i64: 2, 32>}, {pipeline_mode = #tpu.pipeline_mode<synchronous>, transform_indices = @transform_7, window_bounds = array<i64: 1, 32>}, {pipeline_mode = #tpu.pipeline_mode<synchronous>, transform_indices = @transform_8, window_bounds = array<i64: 32, 32>}, {pipeline_mode = #tpu.pipeline_mode<synchronous>, transform_indices = @transform_9, window_bounds = array<i64: 1, 32>}, {transform_indices = @transform_10, window_bounds = array<i64: 1, 16, 32>}, {transform_indices = @transform_11, window_bounds = array<i64: 1, 8, 16>}]} {
    %c0 = arith.constant 0 : index
    %c0_0 = arith.constant 0 : index
    %c0_1 = arith.constant 0 : index
    %0 = vector.load %arg2[%c0, %c0_0, %c0_1] : memref<1x16x32xbf16, #tpu.memory_space<vmem>>, vector<1x16x32xbf16>
    %c0_2 = arith.constant 0 : index
    %1 = memref.load %arg1[%c0_2] : memref<2xf32, #tpu.memory_space<smem>>
    %2 = arith.extf %0 : vector<1x16x32xbf16> to vector<1x16x32xf32>
    %c0_3 = arith.constant 0 : index
    %c0_4 = arith.constant 0 : index
    %3 = vector.load %arg5[%c0_3, %c0_4] : memref<2x32xf32, #tpu.memory_space<vmem>>, vector<1x32xf32>
    %4 = vector.shape_cast %3 : vector<1x32xf32> to vector<1x1x32xf32>
    %5 = vector.broadcast %4 : vector<1x1x32xf32> to vector<1x16x32xf32>
    %6 = arith.mulf %2, %5 : vector<1x16x32xf32>
    %cst = arith.constant dense<0.000000e+00> : vector<1x16xf32>
    %7 = vector.multi_reduction <add>, %6, %cst [2] : vector<1x16x32xf32> to vector<1x16xf32>
    %8 = vector.shape_cast %7 : vector<1x16xf32> to vector<1x16x1xf32>
    %9 = vector.broadcast %1 : f32 to vector<1x16x1xf32>
    %10 = arith.addf %8, %9 : vector<1x16x1xf32>
    %c1 = arith.constant 1 : index
    %c0_5 = arith.constant 0 : index
    %11 = vector.load %arg5[%c1, %c0_5] : memref<2x32xf32, #tpu.memory_space<vmem>>, vector<1x32xf32>
    %12 = vector.shape_cast %11 : vector<1x32xf32> to vector<1x1x32xf32>
    %13 = vector.broadcast %12 : vector<1x1x32xf32> to vector<1x16x32xf32>
    %14 = arith.mulf %2, %13 : vector<1x16x32xf32>
    %cst_6 = arith.constant dense<0.000000e+00> : vector<1x16xf32>
    %15 = vector.multi_reduction <add>, %14, %cst_6 [2] : vector<1x16x32xf32> to vector<1x16xf32>
    %16 = vector.shape_cast %15 : vector<1x16xf32> to vector<1x16x1xf32>
    %cst_7 = arith.constant 0.000000e+00 : f32
    %17 = vector.broadcast %cst_7 : f32 to vector<1x16x1xf32>
    %18 = arith.cmpf ogt, %10, %17 : vector<1x16x1xf32>
    %cst_8 = arith.constant 2.000000e-01 : f32
    %19 = vector.broadcast %cst_8 : f32 to vector<1x16x1xf32>
    %20 = arith.mulf %19, %10 : vector<1x16x1xf32>
    %21 = arith.select %18, %10, %20 : vector<1x16x1xi1>, vector<1x16x1xf32>
    %22 = tpu.transpose %21, [0, 2, 1] : vector<1x16x1xf32> -> vector<1x1x16xf32>
    %c0_9 = arith.constant 0 : index
    %c0_10 = arith.constant 0 : index
    %c0_11 = arith.constant 0 : index
    %23 = vector.load %arg3[%c0_9, %c0_10, %c0_11] : memref<1x8x16xi8, #tpu.memory_space<vmem>>, vector<1x8x16xi8>
    %24 = arith.sitofp %23 : vector<1x8x16xi8> to vector<1x8x16xf32>
    %cst_12 = arith.constant 0.000000e+00 : f32
    %25 = vector.broadcast %cst_12 : f32 to vector<1x8x16xf32>
    %26 = arith.cmpf ogt, %24, %25 : vector<1x8x16xf32>
    %cst_13 = arith.constant -9.000000e+15 : f32
    %27 = vector.shape_cast %22 : vector<1x1x16xf32> to vector<1x1x16xf32>
    %28 = vector.broadcast %27 : vector<1x1x16xf32> to vector<1x8x16xf32>
    %29 = vector.broadcast %cst_13 : f32 to vector<1x8x16xf32>
    %30 = arith.select %26, %28, %29 : vector<1x8x16xi1>, vector<1x8x16xf32>
    %cst_14 = arith.constant dense<0xFF800000> : vector<1x8xf32>
    %31 = vector.multi_reduction <maximumf>, %30, %cst_14 [2] : vector<1x8x16xf32> to vector<1x8xf32>
    %32 = vector.shape_cast %31 : vector<1x8xf32> to vector<1x8x1xf32>
    %33 = vector.broadcast %32 : vector<1x8x1xf32> to vector<1x8x16xf32>
    %34 = arith.subf %30, %33 : vector<1x8x16xf32>
    %35 = math.exp %34 : vector<1x8x16xf32>
    %cst_15 = arith.constant dense<0.000000e+00> : vector<1x8xf32>
    %36 = vector.multi_reduction <add>, %35, %cst_15 [2] : vector<1x8x16xf32> to vector<1x8xf32>
    %37 = vector.shape_cast %36 : vector<1x8xf32> to vector<1x8x1xf32>
    %38 = tpu.reciprocal %37 {approx = true} : vector<1x8x1xf32> -> vector<1x8x1xf32>
    %39 = vector.broadcast %38 : vector<1x8x1xf32> to vector<1x8x16xf32>
    %40 = arith.mulf %35, %39 : vector<1x8x16xf32>
    %41 = arith.truncf %40 : vector<1x8x16xf32> to vector<1x8x16xbf16>
    "tpu.trace_start"() <{level = 10 : i32, message = "ben,bnf->bef"}> : () -> ()
    %cst_16 = arith.constant dense<0.000000e+00> : vector<1x8x32xf32>
    %42 = tpu.matmul %41, %0, %cst_16 {dimension_numbers = #tpu.dot_dimension_numbers<[2], [1], [1], [2], [0, 0, 0, 1, 1, 2], [0], [0]>} : vector<1x8x16xbf16>, vector<1x16x32xbf16>, vector<1x8x32xf32> -> vector<1x8x32xf32>
    "tpu.trace_stop"() : () -> ()
    %c0_17 = arith.constant 0 : index
    %c0_18 = arith.constant 0 : index
    %43 = vector.load %arg6[%c0_17, %c0_18] : memref<1x32xf32, #tpu.memory_space<vmem>>, vector<1x32xf32>
    %44 = vector.shape_cast %43 : vector<1x32xf32> to vector<1x1x32xf32>
    %45 = vector.broadcast %44 : vector<1x1x32xf32> to vector<1x8x32xf32>
    %46 = arith.mulf %42, %45 : vector<1x8x32xf32>
    %cst_19 = arith.constant dense<0.000000e+00> : vector<1x8xf32>
    %47 = vector.multi_reduction <add>, %46, %cst_19 [2] : vector<1x8x32xf32> to vector<1x8xf32>
    %48 = vector.shape_cast %47 : vector<1x8xf32> to vector<1x8x1xf32>
    %49 = tpu.transpose %48, [0, 2, 1] : vector<1x8x1xf32> -> vector<1x1x8xf32>
    %50 = vector.broadcast %16 : vector<1x16x1xf32> to vector<1x16x8xf32>
    %51 = vector.broadcast %49 : vector<1x1x8xf32> to vector<1x16x8xf32>
    %52 = arith.addf %50, %51 : vector<1x16x8xf32>
    %cst_20 = arith.constant 0.000000e+00 : f32
    %53 = vector.broadcast %cst_20 : f32 to vector<1x16x8xf32>
    %54 = arith.cmpf ogt, %52, %53 : vector<1x16x8xf32>
    %cst_21 = arith.constant 2.000000e-01 : f32
    %55 = vector.broadcast %cst_21 : f32 to vector<1x16x8xf32>
    %56 = arith.mulf %55, %52 : vector<1x16x8xf32>
    %57 = arith.select %54, %52, %56 : vector<1x16x8xi1>, vector<1x16x8xf32>
    %c0_22 = arith.constant 0 : index
    %c0_23 = arith.constant 0 : index
    %c0_24 = arith.constant 0 : index
    %58 = vector.load %arg4[%c0_22, %c0_23, %c0_24] : memref<1x16x8xi8, #tpu.memory_space<vmem>>, vector<1x16x8xi8>
    %59 = arith.sitofp %58 : vector<1x16x8xi8> to vector<1x16x8xf32>
    %cst_25 = arith.constant 0.000000e+00 : f32
    %60 = vector.broadcast %cst_25 : f32 to vector<1x16x8xf32>
    %61 = arith.cmpf ogt, %59, %60 : vector<1x16x8xf32>
    %cst_26 = arith.constant -9.000000e+15 : f32
    %62 = vector.broadcast %cst_26 : f32 to vector<1x16x8xf32>
    %63 = arith.select %61, %57, %62 : vector<1x16x8xi1>, vector<1x16x8xf32>
    %cst_27 = arith.constant dense<0xFF800000> : vector<1x16xf32>
    %64 = vector.multi_reduction <maximumf>, %63, %cst_27 [2] : vector<1x16x8xf32> to vector<1x16xf32>
    %65 = vector.shape_cast %64 : vector<1x16xf32> to vector<1x16x1xf32>
    %66 = vector.broadcast %65 : vector<1x16x1xf32> to vector<1x16x8xf32>
    %67 = arith.subf %63, %66 : vector<1x16x8xf32>
    %68 = math.exp %67 : vector<1x16x8xf32>
    %cst_28 = arith.constant dense<0.000000e+00> : vector<1x16xf32>
    %69 = vector.multi_reduction <add>, %68, %cst_28 [2] : vector<1x16x8xf32> to vector<1x16xf32>
    %70 = vector.shape_cast %69 : vector<1x16xf32> to vector<1x16x1xf32>
    %71 = tpu.reciprocal %70 {approx = true} : vector<1x16x1xf32> -> vector<1x16x1xf32>
    %72 = vector.broadcast %71 : vector<1x16x1xf32> to vector<1x16x8xf32>
    %73 = arith.mulf %68, %72 : vector<1x16x8xf32>
    %74 = arith.truncf %73 : vector<1x16x8xf32> to vector<1x16x8xbf16>
    %75 = arith.truncf %42 : vector<1x8x32xf32> to vector<1x8x32xbf16>
    "tpu.trace_start"() <{level = 10 : i32, message = "bne,bef->bnf"}> : () -> ()
    %cst_29 = arith.constant dense<0.000000e+00> : vector<1x16x32xf32>
    %76 = tpu.matmul %74, %75, %cst_29 {dimension_numbers = #tpu.dot_dimension_numbers<[2], [1], [1], [2], [0, 0, 0, 1, 1, 2], [0], [0]>} : vector<1x16x8xbf16>, vector<1x8x32xbf16>, vector<1x16x32xf32> -> vector<1x16x32xf32>
    %cst_30 = arith.constant 0.000000e+00 : f32
    "tpu.trace_stop"() : () -> ()
    %77 = vector.broadcast %cst_30 : f32 to vector<1x16x32xf32>
    %78 = arith.cmpf ogt, %76, %77 : vector<1x16x32xf32>
    %cst_31 = arith.constant 0.000000e+00 : f32
    %79 = vector.broadcast %cst_31 : f32 to vector<1x16x32xf32>
    %80 = arith.minimumf %76, %79 : vector<1x16x32xf32>
    %81 = math.exp %80 : vector<1x16x32xf32>
    %cst_32 = arith.constant 1.000000e+00 : f32
    %82 = vector.broadcast %cst_32 : f32 to vector<1x16x32xf32>
    %83 = arith.subf %81, %82 : vector<1x16x32xf32>
    %84 = arith.select %78, %76, %83 : vector<1x16x32xi1>, vector<1x16x32xf32>
    %85 = arith.truncf %84 : vector<1x16x32xf32> to vector<1x16x32xbf16>
    %86 = vector.shape_cast %85 : vector<1x16x32xbf16> to vector<16x32xbf16>
    %c0_33 = arith.constant 0 : index
    %c0_34 = arith.constant 0 : index
    %87 = vector.load %arg9[%c0_33, %c0_34] : memref<32x32xbf16, #tpu.memory_space<vmem>>, vector<32x32xbf16>
    %cst_35 = arith.constant dense<0.000000e+00> : vector<16x32xf32>
    %88 = tpu.matmul %86, %87, %cst_35 {dimension_numbers = #tpu.dot_dimension_numbers<[1], [0], [0], [1], [0, 0, 1, 1], [], []>} : vector<16x32xbf16>, vector<32x32xbf16>, vector<16x32xf32> -> vector<16x32xf32>
    %c0_36 = arith.constant 0 : index
    %c0_37 = arith.constant 0 : index
    %89 = vector.load %arg10[%c0_36, %c0_37] : memref<1x32xf32, #tpu.memory_space<vmem>>, vector<1x32xf32>
    %90 = vector.broadcast %89 : vector<1x32xf32> to vector<16x32xf32>
    %91 = arith.addf %88, %90 : vector<16x32xf32>
    %92 = vector.shape_cast %91 : vector<16x32xf32> to vector<1x16x32xf32>
    %93 = arith.truncf %92 : vector<1x16x32xf32> to vector<1x16x32xbf16>
    %c1_38 = arith.constant 1 : index
    %94 = memref.load %arg1[%c1_38] : memref<2xf32, #tpu.memory_space<smem>>
    %95 = arith.extf %85 : vector<1x16x32xbf16> to vector<1x16x32xf32>
    %c0_39 = arith.constant 0 : index
    %c0_40 = arith.constant 0 : index
    %96 = vector.load %arg7[%c0_39, %c0_40] : memref<2x32xf32, #tpu.memory_space<vmem>>, vector<1x32xf32>
    %97 = vector.shape_cast %96 : vector<1x32xf32> to vector<1x1x32xf32>
    %98 = vector.broadcast %97 : vector<1x1x32xf32> to vector<1x16x32xf32>
    %99 = arith.mulf %95, %98 : vector<1x16x32xf32>
    %cst_41 = arith.constant dense<0.000000e+00> : vector<1x16xf32>
    %100 = vector.multi_reduction <add>, %99, %cst_41 [2] : vector<1x16x32xf32> to vector<1x16xf32>
    %101 = vector.shape_cast %100 : vector<1x16xf32> to vector<1x16x1xf32>
    %102 = vector.broadcast %94 : f32 to vector<1x16x1xf32>
    %103 = arith.addf %101, %102 : vector<1x16x1xf32>
    %c1_42 = arith.constant 1 : index
    %c0_43 = arith.constant 0 : index
    %104 = vector.load %arg7[%c1_42, %c0_43] : memref<2x32xf32, #tpu.memory_space<vmem>>, vector<1x32xf32>
    %105 = vector.shape_cast %104 : vector<1x32xf32> to vector<1x1x32xf32>
    %106 = vector.broadcast %105 : vector<1x1x32xf32> to vector<1x16x32xf32>
    %107 = arith.mulf %95, %106 : vector<1x16x32xf32>
    %cst_44 = arith.constant dense<0.000000e+00> : vector<1x16xf32>
    %108 = vector.multi_reduction <add>, %107, %cst_44 [2] : vector<1x16x32xf32> to vector<1x16xf32>
    %109 = vector.shape_cast %108 : vector<1x16xf32> to vector<1x16x1xf32>
    %cst_45 = arith.constant 0.000000e+00 : f32
    %110 = vector.broadcast %cst_45 : f32 to vector<1x16x1xf32>
    %111 = arith.cmpf ogt, %103, %110 : vector<1x16x1xf32>
    %cst_46 = arith.constant 2.000000e-01 : f32
    %112 = vector.broadcast %cst_46 : f32 to vector<1x16x1xf32>
    %113 = arith.mulf %112, %103 : vector<1x16x1xf32>
    %114 = arith.select %111, %103, %113 : vector<1x16x1xi1>, vector<1x16x1xf32>
    %115 = tpu.transpose %114, [0, 2, 1] : vector<1x16x1xf32> -> vector<1x1x16xf32>
    %c0_47 = arith.constant 0 : index
    %c0_48 = arith.constant 0 : index
    %c0_49 = arith.constant 0 : index
    %116 = vector.load %arg3[%c0_47, %c0_48, %c0_49] : memref<1x8x16xi8, #tpu.memory_space<vmem>>, vector<1x8x16xi8>
    %117 = arith.sitofp %116 : vector<1x8x16xi8> to vector<1x8x16xf32>
    %cst_50 = arith.constant 0.000000e+00 : f32
    %118 = vector.broadcast %cst_50 : f32 to vector<1x8x16xf32>
    %119 = arith.cmpf ogt, %117, %118 : vector<1x8x16xf32>
    %cst_51 = arith.constant -9.000000e+15 : f32
    %120 = vector.shape_cast %115 : vector<1x1x16xf32> to vector<1x1x16xf32>
    %121 = vector.broadcast %120 : vector<1x1x16xf32> to vector<1x8x16xf32>
    %122 = vector.broadcast %cst_51 : f32 to vector<1x8x16xf32>
    %123 = arith.select %119, %121, %122 : vector<1x8x16xi1>, vector<1x8x16xf32>
    %cst_52 = arith.constant dense<0xFF800000> : vector<1x8xf32>
    %124 = vector.multi_reduction <maximumf>, %123, %cst_52 [2] : vector<1x8x16xf32> to vector<1x8xf32>
    %125 = vector.shape_cast %124 : vector<1x8xf32> to vector<1x8x1xf32>
    %126 = vector.broadcast %125 : vector<1x8x1xf32> to vector<1x8x16xf32>
    %127 = arith.subf %123, %126 : vector<1x8x16xf32>
    %128 = math.exp %127 : vector<1x8x16xf32>
    %cst_53 = arith.constant dense<0.000000e+00> : vector<1x8xf32>
    %129 = vector.multi_reduction <add>, %128, %cst_53 [2] : vector<1x8x16xf32> to vector<1x8xf32>
    %130 = vector.shape_cast %129 : vector<1x8xf32> to vector<1x8x1xf32>
    %131 = vector.broadcast %130 : vector<1x8x1xf32> to vector<1x8x16xf32>
    %132 = arith.divf %128, %131 : vector<1x8x16xf32>
    %133 = arith.truncf %132 : vector<1x8x16xf32> to vector<1x8x16xbf16>
    "tpu.trace_start"() <{level = 10 : i32, message = "ben,bnf->bef"}> : () -> ()
    %cst_54 = arith.constant dense<0.000000e+00> : vector<1x8x32xf32>
    %134 = tpu.matmul %133, %93, %cst_54 {dimension_numbers = #tpu.dot_dimension_numbers<[2], [1], [1], [2], [0, 0, 0, 1, 1, 2], [0], [0]>} : vector<1x8x16xbf16>, vector<1x16x32xbf16>, vector<1x8x32xf32> -> vector<1x8x32xf32>
    "tpu.trace_stop"() : () -> ()
    %c0_55 = arith.constant 0 : index
    %c0_56 = arith.constant 0 : index
    %135 = vector.load %arg8[%c0_55, %c0_56] : memref<1x32xf32, #tpu.memory_space<vmem>>, vector<1x32xf32>
    %136 = vector.shape_cast %135 : vector<1x32xf32> to vector<1x1x32xf32>
    %137 = vector.broadcast %136 : vector<1x1x32xf32> to vector<1x8x32xf32>
    %138 = arith.mulf %134, %137 : vector<1x8x32xf32>
    %cst_57 = arith.constant dense<0.000000e+00> : vector<1x8xf32>
    %139 = vector.multi_reduction <add>, %138, %cst_57 [2] : vector<1x8x32xf32> to vector<1x8xf32>
    %140 = vector.shape_cast %139 : vector<1x8xf32> to vector<1x8x1xf32>
    %141 = tpu.transpose %140, [0, 2, 1] : vector<1x8x1xf32> -> vector<1x1x8xf32>
    %142 = vector.broadcast %109 : vector<1x16x1xf32> to vector<1x16x8xf32>
    %143 = vector.broadcast %141 : vector<1x1x8xf32> to vector<1x16x8xf32>
    %144 = arith.addf %142, %143 : vector<1x16x8xf32>
    %cst_58 = arith.constant 0.000000e+00 : f32
    %145 = vector.broadcast %cst_58 : f32 to vector<1x16x8xf32>
    %146 = arith.cmpf ogt, %144, %145 : vector<1x16x8xf32>
    %cst_59 = arith.constant 2.000000e-01 : f32
    %147 = vector.broadcast %cst_59 : f32 to vector<1x16x8xf32>
    %148 = arith.mulf %147, %144 : vector<1x16x8xf32>
    %149 = arith.select %146, %144, %148 : vector<1x16x8xi1>, vector<1x16x8xf32>
    %c0_60 = arith.constant 0 : index
    %c0_61 = arith.constant 0 : index
    %c0_62 = arith.constant 0 : index
    %150 = vector.load %arg4[%c0_60, %c0_61, %c0_62] : memref<1x16x8xi8, #tpu.memory_space<vmem>>, vector<1x16x8xi8>
    %151 = arith.sitofp %150 : vector<1x16x8xi8> to vector<1x16x8xf32>
    %cst_63 = arith.constant 0.000000e+00 : f32
    %152 = vector.broadcast %cst_63 : f32 to vector<1x16x8xf32>
    %153 = arith.cmpf ogt, %151, %152 : vector<1x16x8xf32>
    %cst_64 = arith.constant -9.000000e+15 : f32
    %154 = vector.broadcast %cst_64 : f32 to vector<1x16x8xf32>
    %155 = arith.select %153, %149, %154 : vector<1x16x8xi1>, vector<1x16x8xf32>
    %cst_65 = arith.constant dense<0xFF800000> : vector<1x16xf32>
    %156 = vector.multi_reduction <maximumf>, %155, %cst_65 [2] : vector<1x16x8xf32> to vector<1x16xf32>
    %157 = vector.shape_cast %156 : vector<1x16xf32> to vector<1x16x1xf32>
    %158 = vector.broadcast %157 : vector<1x16x1xf32> to vector<1x16x8xf32>
    %159 = arith.subf %155, %158 : vector<1x16x8xf32>
    %160 = math.exp %159 : vector<1x16x8xf32>
    %cst_66 = arith.constant dense<0.000000e+00> : vector<1x16xf32>
    %161 = vector.multi_reduction <add>, %160, %cst_66 [2] : vector<1x16x8xf32> to vector<1x16xf32>
    %162 = vector.shape_cast %161 : vector<1x16xf32> to vector<1x16x1xf32>
    %163 = tpu.reciprocal %162 {approx = true} : vector<1x16x1xf32> -> vector<1x16x1xf32>
    %164 = vector.broadcast %163 : vector<1x16x1xf32> to vector<1x16x8xf32>
    %165 = arith.mulf %160, %164 : vector<1x16x8xf32>
    %166 = arith.truncf %165 : vector<1x16x8xf32> to vector<1x16x8xbf16>
    %167 = arith.truncf %134 : vector<1x8x32xf32> to vector<1x8x32xbf16>
    "tpu.trace_start"() <{level = 10 : i32, message = "bne,bef->bnf"}> : () -> ()
    %cst_67 = arith.constant dense<0.000000e+00> : vector<1x16x32xf32>
    %168 = tpu.matmul %166, %167, %cst_67 {dimension_numbers = #tpu.dot_dimension_numbers<[2], [1], [1], [2], [0, 0, 0, 1, 1, 2], [0], [0]>} : vector<1x16x8xbf16>, vector<1x8x32xbf16>, vector<1x16x32xf32> -> vector<1x16x32xf32>
    "tpu.trace_stop"() : () -> ()
    %169 = arith.truncf %168 : vector<1x16x32xf32> to vector<1x16x32xbf16>
    %c0_68 = arith.constant 0 : index
    %c0_69 = arith.constant 0 : index
    %c0_70 = arith.constant 0 : index
    %170 = vector.load %arg11[%c0_68, %c0_69, %c0_70] : memref<1x16x32xbf16, #tpu.memory_space<vmem>>, vector<1x16x32xbf16>
    tpu.vector_store %arg11[%c0_68, %c0_69, %c0_70], %169 {strides = array<i32>} : memref<1x16x32xbf16, #tpu.memory_space<vmem>>, vector<1x16x32xbf16>,
    %171 = arith.truncf %132 : vector<1x8x16xf32> to vector<1x8x16xbf16>
    %c0_71 = arith.constant 0 : index
    %c0_72 = arith.constant 0 : index
    %c0_73 = arith.constant 0 : index
    %172 = vector.load %arg12[%c0_71, %c0_72, %c0_73] : memref<1x8x16xbf16, #tpu.memory_space<vmem>>, vector<1x8x16xbf16>
    tpu.vector_store %arg12[%c0_71, %c0_72, %c0_73], %171 {strides = array<i32>} : memref<1x8x16xbf16, #tpu.memory_space<vmem>>, vector<1x8x16xbf16>,
    return
  }
  func.func @transform_0(%arg0: i32) -> i32 {
    %c0_i32 = arith.constant 0 : i32
    %c0_i32_0 = arith.constant 0 : i32
    return %c0_i32 : i32
  }
  func.func @transform_1(%arg0: i32) -> (i32, i32, i32) {
    %c0_i32 = arith.constant 0 : i32
    %c0_i32_0 = arith.constant 0 : i32
    %c0_i32_1 = arith.constant 0 : i32
    return %arg0, %c0_i32, %c0_i32_0 : i32, i32, i32
  }
  func.func @transform_2(%arg0: i32) -> (i32, i32, i32) {
    %c0_i32 = arith.constant 0 : i32
    %c0_i32_0 = arith.constant 0 : i32
    %c0_i32_1 = arith.constant 0 : i32
    return %arg0, %c0_i32, %c0_i32_0 : i32, i32, i32
  }
  func.func @transform_3(%arg0: i32) -> (i32, i32, i32) {
    %c0_i32 = arith.constant 0 : i32
    %c0_i32_0 = arith.constant 0 : i32
    %c0_i32_1 = arith.constant 0 : i32
    return %arg0, %c0_i32, %c0_i32_0 : i32, i32, i32
  }
  func.func @transform_4(%arg0: i32) -> (i32, i32) {
    %c0_i32 = arith.constant 0 : i32
    %c0_i32_0 = arith.constant 0 : i32
    %c0_i32_1 = arith.constant 0 : i32
    return %c0_i32, %c0_i32_0 : i32, i32
  }
  func.func @transform_5(%arg0: i32) -> (i32, i32) {
    %c0_i32 = arith.constant 0 : i32
    %c0_i32_0 = arith.constant 0 : i32
    %c0_i32_1 = arith.constant 0 : i32
    return %c0_i32, %c0_i32_0 : i32, i32
  }
  func.func @transform_6(%arg0: i32) -> (i32, i32) {
    %c0_i32 = arith.constant 0 : i32
    %c0_i32_0 = arith.constant 0 : i32
    %c0_i32_1 = arith.constant 0 : i32
    return %c0_i32, %c0_i32_0 : i32, i32
  }
  func.func @transform_7(%arg0: i32) -> (i32, i32) {
    %c0_i32 = arith.constant 0 : i32
    %c0_i32_0 = arith.constant 0 : i32
    %c0_i32_1 = arith.constant 0 : i32
    return %c0_i32, %c0_i32_0 : i32, i32
  }
  func.func @transform_8(%arg0: i32) -> (i32, i32) {
    %c0_i32 = arith.constant 0 : i32
    %c0_i32_0 = arith.constant 0 : i32
    %c0_i32_1 = arith.constant 0 : i32
    return %c0_i32, %c0_i32_0 : i32, i32
  }
  func.func @transform_9(%arg0: i32) -> (i32, i32) {
    %c0_i32 = arith.constant 0 : i32
    %c0_i32_0 = arith.constant 0 : i32
    %c0_i32_1 = arith.constant 0 : i32
    return %c0_i32, %c0_i32_0 : i32, i32
  }
  func.func @transform_10(%arg0: i32) -> (i32, i32, i32) {
    %c0_i32 = arith.constant 0 : i32
    %c0_i32_0 = arith.constant 0 : i32
    %c0_i32_1 = arith.constant 0 : i32
    return %arg0, %c0_i32, %c0_i32_0 : i32, i32, i32
  }
  func.func @transform_11(%arg0: i32) -> (i32, i32, i32) {
    %c0_i32 = arith.constant 0 : i32
    %c0_i32_0 = arith.constant 0 : i32
    %c0_i32_1 = arith.constant 0 : i32
    return %arg0, %c0_i32, %c0_i32_0 : i32, i32, i32
  }
}

</mosaic_0001>

<bundles_post_ra>
// kernel: hgnn_forward.1
= control target key start
LH: loop header
LB: loop body
LE: loop exit
PB: predicated region body
PF: predicated region fallthrough
CT: control target
= control target key end

     0   :  { %s1888_s0 = inlined_call_operand.vmem [shape: f32[2], index: 0, kind: input, shape index: {}]   ;;  %s1889_s1 = inlined_call_operand.vmem [shape: bf16[2,16,32], index: 1, kind: input, shape index: {}]   ;;  %s1890_s2 = inlined_call_operand.vmem [shape: s8[2,8,16], index: 2, kind: input, shape index: {}]   ;;  %s1891_s3 = inlined_call_operand.vmem [shape: s8[2,16,8], index: 3, kind: input, shape index: {}]   ;;  %s1892_s4 = inlined_call_operand.vmem [shape: f32[2,32], index: 4, kind: input, shape index: {}]   ;;  %s1893_s5 = inlined_call_operand.vmem [shape: f32[1,32], index: 5, kind: input, shape index: {}]   ;;  %s1894_s6 = inlined_call_operand.vmem [shape: f32[2,32], index: 6, kind: input, shape index: {}]   ;;  %s1895_s7 = inlined_call_operand.vmem [shape: f32[1,32], index: 7, kind: input, shape index: {}]   ;;  %s1896_s8 = inlined_call_operand.vmem [shape: bf16[32,32], index: 8, kind: input, shape index: {}]   ;;  %s1897_s9 = inlined_call_operand.vmem [shape: f32[1,32], index: 9, kind: input, shape index: {}]   ;;  %s1898_s10 = inlined_call_operand.hbm [shape: bf16[2,16,32], index: 10, kind: output, shape index: {0}]   ;;  %s1899_s11 = inlined_call_operand.hbm [shape: bf16[2,8,16], index: 11, kind: output, shape index: {1}]  }
   0x1   :  { %1900 = sst [smem:[#allocation11_spill]] %s1888_s0 }
   0x2   :  { %1901 = sst [smem:[#allocation12_spill]] %s1889_s1 }
   0x3   :  { %17 = vsyncpa [#allocation4], 0 }
   0x4   :  { %18 = vsyncpa [#allocation3], 0 }
   0x5   :  { %20 = vsyncpa [#allocation3 + $0x1], 0 }
   0x6   :  { %21 = vsyncpa [#allocation7], 0 }
   0x7   :  { %23 = vsyncpa [#allocation7 + $0x1], 0  ;;  %s1625_s17 = smov 0   ;;  %s1627_s18 = smov 0  }
   0x8   :  { %s1629_s19 = smov 0   ;;  %s1631_s20 = smov 0  }
   0x9 LB: > { %s1646_s21 = sadd.s32 4294967295, %s1556_s20   ;;  %s1256_s22 = sadd.s32 4294967294, %s1556_s20   ;;  %s1556_s20 = sphi %s1631_s20, %s1910_s20   ;;  %s1552_s19 = sphi %s1629_s19, %s1909_s19   ;;  %s1548_s18 = sphi %s1627_s18, %s1908_s18   ;;  %s1544_s17 = sphi %s1625_s17, %s1907_s17  }
   0xa   : > { %s1650_s23 = sadd.s32 1, %s1556_s20   ;;  %s261_s24 = sadd.s32 1, %s1552_s19 }
   0xb   : > { %s258_s25 = ssub.s32 %s1556_s20, %s1650_s23  ;;  %p271_p0 = scmp.ne.s32.totalorder %s1552_s19, %s1548_s18 }
   0xc   : > { %p259_p1 = scmp.eq.s32.totalorder %s258_s25, 0  ;;  %p272_p2 = scmp.eq.s32.totalorder %s1646_s21, 1 }
   0xd   : > { %p277_p3 = scmp.ne.s32.totalorder %s1548_s18, %s1544_s17  ;;  %p278_p4 = scmp.eq.s32.totalorder %s1256_s22, 1 }
   0xe   : > { %s1661_s26 = scalar_select %p259_p1, %s1552_s19, %s261_s24  }
   0xf   : > { %p1663_p5 = por %p272_p2, %p271_p0  ;;  %p1667_p6 = por %p278_p4, %p277_p3 }
  0x10   : > { %p1257_p7 = scmp.ge.s32.totalorder %s1556_s20, 1  ;;  %p311_p8 = scmp.lt.s32.totalorder %s1556_s20, 3 }
  0x11   : > { %p1371_p9 = scmp.eq.s32.totalorder %s1646_s21, 0  ;;  %s1905_s0 = sld [smem:[#allocation11_spill]] }
  0x12   : > { %p1674_p10 = pnand %p1257_p7, %p311_p8 }
  0x14   : > { %p1360_p11 = pneg %p1674_p10 }
  0x16   : > { %p1361_p12 = pnand %p1371_p9, %p1360_p11 }
  0x17   : > { %s324_s13 = sshll.u32 %s1905_s0, 4  ;;  %s325_s13 = int_to_ptr.vmem [resolvable:$true] %s324_s13 }
  0x18   : > { %s1443_s14 = scalar_lea.vmem %s325_s13, 16  ;;  %p1445_p0 = pneg %p1361_p12 }
  0x19   : > { %p1444_p13 = scmp.ne.s32.totalorder %s325_s13, %s1443_s14  ;;  %p1451_p3 = scmp.lt.s32.totalorder %s325_s13, %s325_s13 }
  0x1a   : > { %p1452_p4 = scmp.lt.s32.totalorder %s1443_s14, %s1443_s14 }
  0x1b   : > { %p1446_p1 = pnand %p1445_p0, %p1444_p13 }
  0x1c   : > { %p1453_p7 = por %p1452_p4, %p1451_p3 }
  0x1d   : > { %p1447_p2 = pneg %p1446_p1 }
  0x1f   : > { %p1454_p8 = pnand %p1453_p7, %p1447_p2 }
  0x21   : > { %1457 = shalt.err (!%p1454_p8)
}
  0x22   : > { %s1558_s15 = smov [#allocation2]   ;;  %378 = sbr.rel (%p1674_p10) target bundleno = 3345 (0xd11), region = 60 }
  0x23   : > { %1363 = dma.vmem_to_smem (!%p1361_p12), %s325_s13, 16, %s1558_s15, [#allocation4]  }
  0x29   : > { %1531 = dma.done.wait (%p1371_p9), [#allocation4], 16  }
  0x2a   : > { %1533 = vsyncadd (%p1371_p9), [#allocation4], 4294967280 }
  0x2b   : > { %384 = sfence }
  0x2c   : > { %p433_p11 = scmp.lt.s32.totalorder %s1646_s21, 1  ;;  %s1906_s1 = sld [smem:[#allocation12_spill]]  ;;  %v1269_v1 = vld [vmem:[%s1892_s4] ss:$0 sm:$0xff]  ;;  %vm460_vm0 = vcmask 261120   ;;  %v525_v17 = vlaneseq  ;;  %vm530_vm4 = vcmask 130048  }
  0x2d   : > { %s450_s13 = sld [smem:[#allocation2]]  ;;  %v1559_v32 = vmov 0.0   ;;  %vm1560_vm5 = vmmov 0   ;;  %v1273_v37 = vld [vmem:[%s1893_s5] ss:$0 sm:$0xff]  ;;  %vm685_vm6 = vcmask 1043456  }
  0x2e   : > { %s1693_s16 = scalar_select %p433_p11, %s1646_s21, 1  ;;  %v526_v20 = vshrl.u32 %v525_v17, 7  ;;  %1320 = vmatprep.subr.bf16.mxu0 %v1559_v32  ;;  %1322 = vmatprep.mubr.msk.bf16.mxu0 %vm1560_vm5, %v1559_v32  ;;  %v1270_v38 = vld [vmem:[%s1892_s4 + $0x1] ss:$0 sm:$0xff]  ;;  %vm657_vm10 = vcmask 64512  }
  0x2f   : > { %1326 = vmatprep.subr.bf16.mxu1 %v1559_v32  ;;  %1328 = vmatprep.mubr.msk.bf16.mxu1 %vm1560_vm5, %v1559_v32 }
  0x30   : > { %s1296_s22 = sshll.u32 %s1693_s16, 3  ;;  %s1266_s14 = sshll.u32 %s1693_s16, 1  ;;  %v1719_v22 = vsub.s32 0, %v526_v20 }
  0x31   : > { %s1716_s24 = scalar_lea.vmem %s1890_s2, %s1266_s14  ;;  %s1281_s14 = sld [smem:[#allocation2 + $0x1]] }
  0x32   : > { %s437_s30 = scalar_lea.vmem %s1906_s1, %s1296_s22  ;;  %v521_v18 = vld [vmem:[%s1716_s24] sm:$0x3] }
  0x33   : > { %v1699_v0 = vld [vmem:[%s437_s30] sm:$0xff]   ;;  %v467_v8 = vstv %s450_s13  ;;  %v522_v19 = vunpack.c.0.s8 %v521_v18  ;;  %s1297_s13 = sshll.u32 %s1693_s16, 2 }
  0x34   : > { %v451_v2 = vunpack.c.l.bf16 %v1699_v0  ;;  %v452_v3 = vunpack.c.h.bf16 %v1699_v0  ;;  %1321 = vmatpush3.bf16.msra.mxu0 %v1699_v0  ;;  %s1754_s22 = scalar_lea.vmem %s1891_s3, %s1297_s13 }
  0x35   : > { %v523_v21 = vcvt.s32.f32 %v522_v19  ;;  %1332 = vmatprep.subr.bf16.mxu0 %v1559_v32  ;;  %v1302_v53 = vld [vmem:[%s1754_s22] sm:$0xf]  }
  0x36   : > { %v458_v4 = vmul.f32 %v1269_v1, %v451_v2  ;;  %v459_v5 = vmul.f32 %v1269_v1, %v452_v3  ;;  %v475_v43 = vmul.f32 %v1270_v38, %v451_v2  ;;  %v476_v49 = vmul.f32 %v1270_v38, %v452_v3 }
  0x37   : > { %vm524_vm3 = vcmp.gt.f32.partialorder %v523_v21, 0.0  ;;  %v1303_v55 = vunpack.c.0.s8 %v1302_v53  ;;  %v1304_v56 = vunpack.c.1.s8 %v1302_v53 }
  0x38   : > { %v461_v6 = vsel %vm460_vm0, %v458_v4, 0.0  ;;  %v464_v7 = vsel %vm460_vm0, %v459_v5, 0.0  ;;  %v477_v48 = vsel %vm460_vm0, %v475_v43, 0.0  ;;  %v480_v50 = vsel %vm460_vm0, %v476_v49, 0.0  ;;  %v1282_v43 = vld [vmem:[%s1894_s6] ss:$0 sm:$0xff] }
  0x39   : > { %462 = vadd.xlane.f32.xlu0 %v461_v6  ;;  %v651_v58 = vcvt.s32.f32 %v1303_v55  ;;  %v652_v62 = vcvt.s32.f32 %v1304_v56 }
  0x3b   : > { %vm653_vm7 = vcmp.gt.f32.partialorder %v651_v58, 0.0  ;;  %vm654_vm11 = vcmp.gt.f32.partialorder %v652_v62, 0.0  ;;  %v1277_v58 = vld [vmem:[%s1897_s9] ss:$0 sm:$0xff] }
  0x3d   : > { %465 = vadd.xlane.f32.xlu0 %v464_v7 }
  0xc6   : > { %v463_v9 = vpop.xlane.xlu0 %462 }
  0xc7   : > { %v468_v10 = vadd.f32 %v467_v8, %v463_v9 }
  0xc9   : > { %vm483_vm1 = vcmp.gt.f32.partialorder %v468_v10, 0.0  ;;  %v485_v11 = vmul.f32 0.2, %v468_v10 }
  0xca   : > { %v466_v12 = vpop.xlane.xlu0 %465 }
  0xcb   : > { %v469_v13 = vadd.f32 %v467_v8, %v466_v12  ;;  %v487_v14 = vsel %vm483_vm1, %v468_v10, %v485_v11 }
  0xcc   : > { %489 = vxpose.xlu1.b32.start [1/2] (short) (narrow) %v487_v14, 8 }
  0xcd   : > { %vm484_vm2 = vcmp.gt.f32.partialorder %v469_v13, 0.0  ;;  %v486_v15 = vmul.f32 0.2, %v469_v13 }
  0xcf   : > { %v488_v16 = vsel %vm484_vm2, %v469_v13, %v486_v15  ;;  %vm1092_vm2 = vcmask 125952  }
  0xd0   : > { %490 = vxpose.xlu1.b32.end [2/2] (short) (narrow) %v488_v16, 8 }
 0x14c   : > { %v505_v23 = vpop.trf.xlu1 }
 0x14d   : > { %v528_v24 = vrot.slane %v505_v23, %v1719_v22 }
 0x14f   : > { %v529_v25 = vsel %vm524_vm3, %v528_v24, -9e+15 }
 0x150   : > { %v531_v26 = vsel %vm530_vm4, %v529_v25, -inf }
 0x151   : > { %532 = vmax.xlane.f32.xlu0 %v531_v26  ;;  %v1413_v26 = vld [vmem:[%s1896_s8 + $0x8] sm:$0xff]  }
 0x1de   : > { %v533_v27 = vpop.xlane.xlu0 %532 }
 0x1df   : > { %v534_v28 = vsub.f32 %v529_v25, %v533_v27  ;;  %v1412_v25 = vld [vmem:[%s1896_s8] sm:$0xff]  }
 0x1e1   : > { %v535_v29 = vmul.f32 1.442695, %v534_v28 }
 0x1e3   : > { %1415 = vpow2.f32 %v535_v29 }
 0x1ed   : > { %v1416_v30 = vpop.eup %1415 }
 0x1ee   : > { %v537_v31 = vsel %vm530_vm4, %v1416_v30, 0.0 }
 0x1ef   : > { %538 = vadd.xlane.f32.xlu1 %v537_v31 }
 0x27c   : > { %v539_v33 = vpop.xlane.xlu1 %538 }
 0x27d   : > { %1417 = vrcp.f32 %v539_v33 }
 0x287   : > { %v1418_v34 = vpop.eup %1417 }
 0x288   : > { %v541_v35 = vmul.f32 %v1418_v34, %v1416_v30 }
 0x28a   : > { %v542_v36 = vpack.c.bf16 %v541_v35, %v541_v35 }
 0x28c   : > { %1323 = vmatmul.mubr.msk.bf16.vlgmr.msra.gmra.mrb[0].mxu0 %vm530_vm4, %v542_v36 }
 0x28d   : > { %1336 = vmatprep.mubr.msk.bf16.mxu0 %vm1560_vm5, %v1559_v32  ;;  %1333 = vmatpush3.bf16.msra.mxu0 %v1412_v25 }
 0x28e   : > { %1334 = vmatprep.subr.bf16.mxu0 %v1559_v32 }
 0x291   : > { %1335 = vmatpush3.bf16.msra.mxu0 %v1413_v26 }
 0x292   : > { %1346 = vmatprep.subr.bf16.mxu0 %v1559_v32 }
 0x35f   : > { %v586_v39 = vpop.f32.mrb[0].mxu0 }
 0x360   : > { %v599_v40 = vmul.f32 %v1273_v37, %v586_v39  ;;  %v681_v41 = vpack.c.bf16 %v586_v39, %v586_v39  ;;  %v1324_v42 = vpop.f32.mrb[1].mxu0 }
 0x361   : > { %v589_v44 = vpop.f32.mrb[2].mxu0 }
 0x362   : > { %v1325_v45 = vpop.f32.mrb[3].mxu0  ;;  %v687_v46 = vsel %vm685_vm6, %v681_v41, 0  ;;  %v600_v47 = vsel %vm460_vm0, %v599_v40, 0.0 }
 0x363   : > { %1327 = vmatpush3.bf16.msra.mxu1 %v687_v46  ;;  %601 = vadd.xlane.f32.xlu0 %v600_v47 }
 0x364   : > { %1340 = vmatprep.subr.bf16.mxu1 %v1559_v32 }
 0x367   : > { %478 = vadd.xlane.f32.xlu0 %v477_v48 }
 0x36b   : > { %481 = vadd.xlane.f32.xlu0 %v480_v50  ;;  %v827_v50 = vstv %s1281_s14  ;;  %s1561_s14 = smov [#allocation6]  }
 0x36c   : > { %s1462_s0 = sshll.u32 %s1561_s14, 4  ;;  %s1463_s0 = int_to_ptr.vmem [resolvable:$false] %s1462_s0 }
 0x36d   : > { %s1464_s1 = scalar_lea.vmem %s1463_s0, 128 }
 0x3f0   : > { %v602_v51 = vpop.xlane.xlu0 %601 }
 0x3f1   : > { %603 = vxpose.xlu0.b32.start.end [1/1] (short) (narrow) %v602_v51, 8 }
 0x3f4   : > { %v479_v52 = vpop.xlane.xlu0 %478 }
 0x3f8   : > { %v482_v54 = vpop.xlane.xlu0 %481 }
 0x471   : > { %v619_v57 = vpop.trf.xlu0 }
 0x472   : > { %v638_v59 = vrot.slane %v619_v57, %v1719_v22 }
 0x474   : > { %v639_v60 = vadd.f32 %v638_v59, %v479_v52  ;;  %v640_v61 = vadd.f32 %v638_v59, %v482_v54 }
 0x476   : > { %vm641_vm8 = vcmp.gt.f32.partialorder %v639_v60, 0.0  ;;  %v643_v63 = vmul.f32 0.2, %v639_v60  ;;  %vm642_vm9 = vcmp.gt.f32.partialorder %v640_v61, 0.0  ;;  %v644_v0 = vmul.f32 0.2, %v640_v61 }
 0x478   : > { %v645_v1 = vsel %vm641_vm8, %v639_v60, %v643_v63  ;;  %v646_v2 = vsel %vm642_vm9, %v640_v61, %v644_v0 }
 0x479   : > { %v655_v3 = vsel %vm653_vm7, %v645_v1, -9e+15  ;;  %v656_v5 = vsel %vm654_vm11, %v646_v2, -9e+15  ;;  %v881_v2 = vld [vmem:[%s1716_s24] sm:$0x3] }
 0x47a   : > { %v658_v4 = vsel %vm657_vm10, %v655_v3, -inf  ;;  %v661_v6 = vsel %vm657_vm10, %v656_v5, -inf  ;;  %s1794_s24 = sand.u32 1, %s1548_s18  }
 0x47b   : > { %659 = vmax.xlane.f32.xlu1 %v658_v4  ;;  %s1263_s29 = sshll.u32 %s1794_s24, 2 }
 0x47c   : > { %s1798_s12 = scalar_lea.vmem [#allocation6], %s1263_s29  ;;  %s1100_s29 = scalar_lea.sflag [#allocation7], %s1794_s24 }
 0x47d   : > { %s1129_s30 = sshll.u32 %s1798_s12, 4  ;;  %s1130_s30 = int_to_ptr.vmem [resolvable:$true] %s1129_s30 }
 0x47e   : > { %s1458_s13 = scalar_lea.vmem %s1130_s30, 64  ;;  %p1465_p13 = scmp.lt.s32.totalorder %s1130_s30, %s1463_s0 }
 0x47f   : > { %662 = vmax.xlane.f32.xlu1 %v661_v6  ;;  %p1459_p9 = scmp.ne.s32.totalorder %s1130_s30, %s1458_s13  ;;  %p1466_p0 = scmp.lt.s32.totalorder %s1464_s1, %s1458_s13 }
 0x481   : > { %p1460_p10 = pnand %p1459_p9, %p1663_p5  ;;  %p1467_p1 = por %p1466_p0, %p1465_p13 }
 0x483   : > { %p1461_p12 = pneg %p1460_p10 }
 0x485   : > { %p1468_p2 = pnand %p1467_p1, %p1461_p12 }
 0x508   : > { %v660_v7 = vpop.xlane.xlu1 %659 }
 0x509   : > { %v664_v8 = vsub.f32 %v655_v3, %v660_v7  ;;  %v882_v3 = vunpack.c.0.s8 %v881_v2 }
 0x50b   : > { %v666_v9 = vmul.f32 1.442695, %v664_v8  ;;  %v883_v4 = vcvt.s32.f32 %v882_v3 }
 0x50c   : > { %v663_v10 = vpop.xlane.xlu1 %662 }
 0x50d   : > { %1419 = vpow2.f32 %v666_v9  ;;  %v665_v11 = vsub.f32 %v656_v5, %v663_v10  ;;  %vm884_vm1 = vcmp.gt.f32.partialorder %v883_v4, 0.0 }
 0x50f   : > { %v668_v12 = vmul.f32 1.442695, %v665_v11 }
 0x511   : > { %1421 = vpow2.f32 %v668_v12  ;;  %v1283_v12 = vld [vmem:[%s1894_s6 + $0x1] ss:$0 sm:$0xff] }
 0x517   : > { %v1420_v13 = vpop.eup %1419 }
 0x518   : > { %v670_v14 = vsel %vm657_vm10, %v1420_v13, 0.0 }
 0x519   : > { %671 = vadd.xlane.f32.xlu1 %v670_v14 }
 0x51b   : > { %v1422_v15 = vpop.eup %1421 }
 0x51c   : > { %v673_v16 = vsel %vm657_vm10, %v1422_v15, 0.0 }
 0x51d   : > { %674 = vadd.xlane.f32.xlu1 %v673_v16 }
 0x5a6   : > { %v672_v17 = vpop.xlane.xlu1 %671 }
 0x5a7   : > { %1423 = vrcp.f32 %v672_v17 }
 0x5aa   : > { %v675_v18 = vpop.xlane.xlu1 %674 }
 0x5ab   : > { %1425 = vrcp.f32 %v675_v18 }
 0x5b1   : > { %v1424_v19 = vpop.eup %1423 }
 0x5b2   : > { %v678_v21 = vmul.f32 %v1424_v19, %v1420_v13 }
 0x5b5   : > { %v1426_v20 = vpop.eup %1425 }
 0x5b6   : > { %v679_v23 = vmul.f32 %v1426_v20, %v1422_v15 }
 0x5b8   : > { %v680_v24 = vpack.c.bf16 %v679_v23, %v678_v21 }
 0x5ba   : > { %1329 = vmatmul.mubr.msk.bf16.vlgmr.msra.gmra.mrb[0].mxu1 %vm657_vm10, %v680_v24  ;;  %v1285_v24 = vld [vmem:[%s1895_s7] ss:$0 sm:$0xff] }
 0x5bb   : > { %1342 = vmatprep.mubr.msk.bf16.mxu1 %vm1560_vm5, %v1559_v32 }
 0x68d   : > { %v723_v27 = vpop.f32.mrb[0].mxu1 }
 0x68e   : > { %v732_v28 = vmin.f32 %v723_v27, 0.0  ;;  %v1330_v29 = vpop.f32.mrb[1].mxu1  ;;  %vm730_vm12 = vcmp.gt.f32.partialorder %v723_v27, 0.0 }
 0x68f   : > { %v726_v30 = vpop.f32.mrb[2].mxu1 }
 0x690   : > { %v734_v31 = vmul.f32 1.442695, %v732_v28  ;;  %v733_v33 = vmin.f32 %v726_v30, 0.0  ;;  %v1331_v34 = vpop.f32.mrb[3].mxu1  ;;  %vm731_vm13 = vcmp.gt.f32.partialorder %v726_v30, 0.0 }
 0x692   : > { %1427 = vpow2.f32 %v734_v31  ;;  %v736_v35 = vmul.f32 1.442695, %v733_v33 }
 0x694   : > { %1429 = vpow2.f32 %v736_v35 }
 0x69c   : > { %v1428_v36 = vpop.eup %1427 }
 0x69d   : > { %v1275_v37 = vadd.f32 -1.0, %v1428_v36  ;;  %v1306_v36 = vld [vmem:[%s1754_s22] sm:$0xf]   ;;  %s1293_s22 = sshll.u32 %s1646_s21, 6 }
 0x69e   : > { %v1430_v38 = vpop.eup %1429  ;;  %s1817_s25 = scalar_lea.hbm %s1899_s11, %s1293_s22 }
 0x69f   : > { %v1276_v39 = vadd.f32 -1.0, %v1430_v38  ;;  %v740_v40 = vsel %vm730_vm12, %v723_v27, %v1275_v37  ;;  %v1307_v38 = vunpack.c.0.s8 %v1306_v36 }
 0x6a1   : > { %v741_v41 = vsel %vm731_vm13, %v726_v30, %v1276_v39  ;;  %v1308_v39 = vunpack.c.1.s8 %v1306_v36 }
 0x6a2   : > { %v742_v42 = vpack.c.bf16 %v741_v41, %v740_v40  ;;  %v1004_v41 = vcvt.s32.f32 %v1307_v38 }
 0x6a4   : > { %1337 = vmatmul.mubr.msk.bf16.vlgmr.msra.gmra.mrb[4].mxu0 %vm460_vm0, %v742_v42  ;;  %v812_v44 = vunpack.c.l.bf16 %v742_v42  ;;  %v813_v45 = vunpack.c.h.bf16 %v742_v42  ;;  %vm1006_vm3 = vcmp.gt.f32.partialorder %v1004_v41, 0.0 }
 0x6a5   : > { %1348 = vmatprep.mubr.msk.bf16.mxu0 %vm1560_vm5, %v1559_v32 }
 0x6a6   : > { %v819_v46 = vmul.f32 %v1282_v43, %v812_v44  ;;  %v820_v48 = vmul.f32 %v1282_v43, %v813_v45  ;;  %v835_v15 = vmul.f32 %v1283_v12, %v812_v44  ;;  %v836_v17 = vmul.f32 %v1283_v12, %v813_v45 }
 0x6a7   : > { %v1005_v45 = vcvt.s32.f32 %v1308_v39 }
 0x6a8   : > { %v821_v47 = vsel %vm460_vm0, %v819_v46, 0.0  ;;  %v824_v49 = vsel %vm460_vm0, %v820_v48, 0.0  ;;  %v837_v16 = vsel %vm460_vm0, %v835_v15, 0.0  ;;  %v840_v18 = vsel %vm460_vm0, %v836_v17, 0.0 }
 0x6a9   : > { %822 = vadd.xlane.f32.xlu1 %v821_v47  ;;  %vm1007_vm5 = vcmp.gt.f32.partialorder %v1005_v45, 0.0 }
 0x6ad   : > { %825 = vadd.xlane.f32.xlu1 %v824_v49 }
 0x736   : > { %v823_v51 = vpop.xlane.xlu1 %822 }
 0x737   : > { %v828_v52 = vadd.f32 %v827_v50, %v823_v51 }
 0x739   : > { %vm843_vm14 = vcmp.gt.f32.partialorder %v828_v52, 0.0  ;;  %v845_v53 = vmul.f32 0.2, %v828_v52 }
 0x73a   : > { %v826_v54 = vpop.xlane.xlu1 %825 }
 0x73b   : > { %v829_v55 = vadd.f32 %v827_v50, %v826_v54  ;;  %v847_v56 = vsel %vm843_vm14, %v828_v52, %v845_v53 }
 0x73c   : > { %849 = vxpose.xlu0.b32.start [1/2] (short) (narrow) %v847_v56, 8 }
 0x73d   : > { %v846_v32 = vmul.f32 0.2, %v829_v55  ;;  %vm844_vm15 = vcmp.gt.f32.partialorder %v829_v55, 0.0 }
 0x73f   : > { %v848_v57 = vsel %vm844_vm15, %v829_v55, %v846_v32 }
 0x740   : > { %850 = vxpose.xlu0.b32.end [2/2] (short) (narrow) %v848_v57, 8 }
 0x777   : > { %v803_v59 = vpop.f32.mrb[4].mxu0 }
 0x778   : > { %v1338_v60 = vpop.f32.mrb[5].mxu0  ;;  %v804_v62 = vadd.f32 %v1277_v58, %v803_v59 }
 0x779   : > { %v806_v61 = vpop.f32.mrb[6].mxu0 }
 0x77a   : > { %v807_v63 = vadd.f32 %v1277_v58, %v806_v61  ;;  %v1339_v0 = vpop.f32.mrb[7].mxu0 }
 0x77c   : > { %v810_v1 = vpack.c.bf16 %v807_v63, %v804_v62 }
 0x77e   : > { %1341 = vmatpush3.bf16.msra.mxu1 %v810_v1 }
 0x7bc   : > { %v865_v5 = vpop.trf.xlu0 }
 0x7bd   : > { %v888_v6 = vrot.slane %v865_v5, %v1719_v22 }
 0x7bf   : > { %v889_v7 = vsel %vm884_vm1, %v888_v6, -9e+15 }
 0x7c0   : > { %v890_v8 = vsel %vm530_vm4, %v889_v7, -inf }
 0x7c1   : > { %891 = vmax.xlane.f32.xlu1 %v890_v8 }
 0x84e   : > { %v892_v9 = vpop.xlane.xlu1 %891 }
 0x84f   : > { %v893_v10 = vsub.f32 %v889_v7, %v892_v9 }
 0x851   : > { %v894_v11 = vmul.f32 1.442695, %v893_v10 }
 0x853   : > { %1431 = vpow2.f32 %v894_v11 }
 0x85d   : > { %v1432_v13 = vpop.eup %1431 }
 0x85e   : > { %v896_v14 = vsel %vm530_vm4, %v1432_v13, 0.0 }
 0x85f   : > { %897 = vadd.xlane.f32.xlu1 %v896_v14 }
 0x863   : > { %838 = vadd.xlane.f32.xlu1 %v837_v16 }
 0x867   : > { %841 = vadd.xlane.f32.xlu1 %v840_v18 }
 0x8ec   : > { %v898_v19 = vpop.xlane.xlu1 %897 }
 0x8ed   : > { %1433 = vrcp.f32 %v898_v19 }
 0x8f0   : > { %v839_v35 = vpop.xlane.xlu1 %838 }
 0x8f4   : > { %v842_v37 = vpop.xlane.xlu1 %841 }
 0x8f7   : > { %v1434_v20 = vpop.eup %1433 }
 0x8f8   : > { %v900_v21 = vmul.f32 %v1434_v20, %v1432_v13 }
 0x8fa   : > { %v901_v23 = vpack.c.bf16 %v900_v21, %v900_v21 }
 0x8fc   : > { %1343 = vmatmul.mubr.msk.bf16.vlgmr.msra.gmra.mrb[4].mxu1 %vm530_vm4, %v901_v23  ;;  %1093 = vst.msk [vmem:[%s1798_s12] sm:$0xf] %vm1092_vm2, %v901_v23 }
 0x9cf   : > { %v939_v25 = vpop.f32.mrb[4].mxu1 }
 0x9d0   : > { %v952_v26 = vmul.f32 %v1285_v24, %v939_v25  ;;  %v1033_v27 = vpack.c.bf16 %v939_v25, %v939_v25  ;;  %v1344_v28 = vpop.f32.mrb[5].mxu1 }
 0x9d1   : > { %v942_v29 = vpop.f32.mrb[6].mxu1 }
 0x9d2   : > { %v1345_v30 = vpop.f32.mrb[7].mxu1  ;;  %v1038_v31 = vsel %vm685_vm6, %v1033_v27, 0  ;;  %v953_v33 = vsel %vm460_vm0, %v952_v26, 0.0 }
 0x9d3   : > { %1347 = vmatpush3.bf16.msra.mxu0 %v1038_v31  ;;  %954 = vadd.xlane.f32.xlu0 %v953_v33 }
 0xa60   : > { %v955_v34 = vpop.xlane.xlu0 %954 }
 0xa61   : > { %956 = vxpose.xlu1.b32.start.end [1/1] (short) (narrow) %v955_v34, 8 }
 0xae1   : > { %v972_v40 = vpop.trf.xlu1 }
 0xae2   : > { %v991_v42 = vrot.slane %v972_v40, %v1719_v22 }
 0xae4   : > { %v992_v43 = vadd.f32 %v991_v42, %v839_v35  ;;  %v993_v44 = vadd.f32 %v991_v42, %v842_v37 }
 0xae6   : > { %vm994_vm4 = vcmp.gt.f32.partialorder %v992_v43, 0.0  ;;  %v996_v46 = vmul.f32 0.2, %v992_v43  ;;  %vm995_vm0 = vcmp.gt.f32.partialorder %v993_v44, 0.0  ;;  %v997_v47 = vmul.f32 0.2, %v993_v44 }
 0xae8   : > { %v998_v48 = vsel %vm994_vm4, %v992_v43, %v996_v46  ;;  %v999_v49 = vsel %vm995_vm0, %v993_v44, %v997_v47 }
 0xae9   : > { %v1008_v50 = vsel %vm1006_vm3, %v998_v48, -9e+15  ;;  %v1009_v52 = vsel %vm1007_vm5, %v999_v49, -9e+15 }
 0xaea   : > { %v1010_v51 = vsel %vm657_vm10, %v1008_v50, -inf  ;;  %v1013_v53 = vsel %vm657_vm10, %v1009_v52, -inf }
 0xaeb   : > { %1011 = vmax.xlane.f32.xlu0 %v1010_v51 }
 0xaef   : > { %1014 = vmax.xlane.f32.xlu0 %v1013_v53 }
 0xb78   : > { %v1012_v22 = vpop.xlane.xlu0 %1011 }
 0xb79   : > { %v1016_v54 = vsub.f32 %v1008_v50, %v1012_v22 }
 0xb7b   : > { %v1018_v55 = vmul.f32 1.442695, %v1016_v54 }
 0xb7c   : > { %v1015_v56 = vpop.xlane.xlu0 %1014 }
 0xb7d   : > { %1435 = vpow2.f32 %v1018_v55  ;;  %v1017_v32 = vsub.f32 %v1009_v52, %v1015_v56 }
 0xb7f   : > { %v1020_v57 = vmul.f32 1.442695, %v1017_v32 }
 0xb81   : > { %1437 = vpow2.f32 %v1020_v57 }
 0xb87   : > { %v1436_v58 = vpop.eup %1435 }
 0xb88   : > { %v1022_v59 = vsel %vm657_vm10, %v1436_v58, 0.0 }
 0xb89   : > { %1023 = vadd.xlane.f32.xlu0 %v1022_v59 }
 0xb8b   : > { %v1438_v60 = vpop.eup %1437 }
 0xb8c   : > { %v1025_v61 = vsel %vm657_vm10, %v1438_v60, 0.0 }
 0xb8d   : > { %1026 = vadd.xlane.f32.xlu0 %v1025_v61 }
 0xc16   : > { %v1024_v62 = vpop.xlane.xlu0 %1023 }
 0xc17   : > { %1439 = vrcp.f32 %v1024_v62 }
 0xc1a   : > { %v1027_v63 = vpop.xlane.xlu0 %1026 }
 0xc1b   : > { %1441 = vrcp.f32 %v1027_v63 }
 0xc21   : > { %v1440_v0 = vpop.eup %1439 }
 0xc22   : > { %v1030_v2 = vmul.f32 %v1440_v0, %v1436_v58 }
 0xc25   : > { %v1442_v1 = vpop.eup %1441 }
 0xc26   : > { %v1031_v3 = vmul.f32 %v1442_v1, %v1438_v60 }
 0xc28   : > { %v1032_v4 = vpack.c.bf16 %v1031_v3, %v1030_v2 }
 0xc2a   : > { %1349 = vmatmul.mubr.msk.bf16.vlgmr.msra.gmra.mrb[8].mxu0 %vm657_vm10, %v1032_v4 }
 0xc2b   : > { %1471 = shalt.err (!%p1468_p2)
}
 0xc2c   : > { %s1472_s12 = scalar_lea.hbm %s1817_s25, 64  ;;  %s1476_s16 = scalar_lea.hbm %s1899_s11, 128 }
 0xc2d   : > { %p1473_p3 = scmp.ne.s32.totalorder %s1817_s25, %s1472_s12  ;;  %p1477_p8 = scmp.lt.u32.totalorder %s1817_s25, %s1899_s11 }
 0xc2e   : > { %p1478_p11 = scmp.lt.u32.totalorder %s1476_s16, %s1472_s12  ;;  %p1480_p10 = scmp.lt.u32.totalorder %s1472_s12, %s1817_s25 }
 0xc2f   : > { %p1474_p4 = pnand %p1473_p3, %p1663_p5 }
 0xc30   : > { %p1479_p9 = por %p1478_p11, %p1477_p8 }
 0xc31   : > { %p1475_p7 = pneg %p1474_p4 }
 0xc32   : > { %p1481_p12 = por %p1480_p10, %p1479_p9 }
 0xc34   : > { %p1482_p13 = pnand %p1481_p12, %p1475_p7 }
 0xc36   : > { %1485 = shalt.err (!%p1482_p13)
}
 0xc37   : > { %1357 = dma.vmem_to_hbm [thread:$0]  (%p1663_p5), %s1130_s30, 64, %s1817_s25, %s1100_s29   ;;  %vm1089_vm6 = vcmask 257024  }
 0xc38   : > { %s1262_s1 = sshll.u32 %s1794_s24, 3  ;;  %s1300_s15 = sshll.u32 %s1646_s21, 7 }
 0xc39   : > { %s425_s13 = scalar_lea.vmem [#allocation5], %s1262_s1  ;;  %s1845_s25 = scalar_lea.hbm %s1898_s10, %s1300_s15 }
 0xc3a   : > { %s1113_s22 = sshll.u32 %s425_s13, 4  ;;  %s1095_s21 = scalar_lea.sflag [#allocation3], %s1794_s24  ;;  %s1840_s22 = int_to_ptr.vmem [resolvable:$true] %s1113_s22 }
 0xc3b   : > { %s1486_s30 = scalar_lea.vmem %s1840_s22, 128  ;;  %s1562_s29 = smov [#allocation5]  }
 0xc3c   : > { %p1487_p0 = scmp.ne.s32.totalorder %s1840_s22, %s1486_s30  ;;  %s1490_s14 = sshll.u32 %s1562_s29, 4  ;;  %s1491_s14 = int_to_ptr.vmem [resolvable:$false] %s1490_s14 }
 0xc3d   : > { %s1492_s0 = scalar_lea.vmem %s1491_s14, 256  ;;  %p1493_p3 = scmp.lt.s32.totalorder %s1840_s22, %s1491_s14 }
 0xc3e   : > { %p1488_p1 = pnand %p1487_p0, %p1663_p5  ;;  %p1494_p4 = scmp.lt.s32.totalorder %s1492_s0, %s1486_s30 }
 0xc40   : > { %p1489_p2 = pneg %p1488_p1  ;;  %p1495_p7 = por %p1494_p4, %p1493_p3 }
 0xc42   : > { %p1496_p8 = pnand %p1495_p7, %p1489_p2 }
 0xcfd   : > { %v1074_v5 = vpop.f32.mrb[8].mxu0 }
 0xcfe   : > { %v1298_v6 = vpack.c.bf16 %v1074_v5, %v1074_v5  ;;  %v1350_v7 = vpop.f32.mrb[9].mxu0 }
 0xcff   : > { %v1077_v8 = vpop.f32.mrb[10].mxu0 }
 0xd00   : > { %1090 = vst.msk [vmem:[%s425_s13] sm:$0xf] %vm1089_vm6, %v1298_v6  ;;  %v1299_v9 = vpack.c.bf16 %v1077_v8, %v1077_v8  ;;  %v1351_v10 = vpop.f32.mrb[11].mxu0 }
 0xd02   : > { %1091 = vst.msk [vmem:[%s425_s13 + $0x4] sm:$0xf] %vm1089_vm6, %v1299_v9 }
 0xd03   : > { %1499 = shalt.err (!%p1496_p8)
}
 0xd04   : > { %s1500_s1 = scalar_lea.hbm %s1845_s25, 128  ;;  %s1504_s12 = scalar_lea.hbm %s1898_s10, 256 }
 0xd05   : > { %p1501_p11 = scmp.ne.s32.totalorder %s1845_s25, %s1500_s1  ;;  %p1505_p12 = scmp.lt.u32.totalorder %s1845_s25, %s1898_s10 }
 0xd06   : > { %p1506_p13 = scmp.lt.u32.totalorder %s1504_s12, %s1500_s1  ;;  %p1508_p1 = scmp.lt.u32.totalorder %s1500_s1, %s1845_s25 }
 0xd07   : > { %p1502_p9 = pnand %p1501_p11, %p1663_p5 }
 0xd08   : > { %p1507_p0 = por %p1506_p13, %p1505_p12 }
 0xd09   : > { %p1503_p10 = pneg %p1502_p9 }
 0xd0a   : > { %p1509_p2 = por %p1508_p1, %p1507_p0 }
 0xd0c   : > { %p1510_p3 = pnand %p1509_p2, %p1503_p10 }
 0xd0e   : > { %1513 = shalt.err (!%p1510_p3)
}
 0xd0f   : > { %s1563_s30 = smov 64   ;;  %s1564_s14 = smov 4  }
 0xd10   : > { %1356 = dma.vmem_to_hbm [thread:$0]  (%p1663_p5), %s1840_s22, 128, %s1845_s25, %s1095_s21, %s1563_s30, %s1563_s30, %s1564_s14  }
 0xd11 PF: > { %p1373_p4 = scmp.ge.s32.totalorder %s1556_s20, 2  ;;  %s1141_s0 = sand.u32 1, %s1544_s17  }
 0xd12   : > { %s1142_s1 = scalar_lea.sflag [#allocation3], %s1141_s0 }
 0xd13   : > { %p1365_p7 = pnand %p1373_p4, %p1667_p6 }
 0xd15   : > { %1535 = dma.done.wait (!%p1365_p7), %s1142_s1, 128  }
 0xd16   : > { %1537 = vsyncadd (!%p1365_p7), %s1142_s1, 4294967168  ;;  %s1151_s13 = scalar_lea.sflag [#allocation7], %s1141_s0 }
 0xd17   : > { %1539 = dma.done.wait (!%p1365_p7), %s1151_s13, 64  }
 0xd18   : > { %1541 = vsyncadd (!%p1365_p7), %s1151_s13, 4294967232  ;;  %p26_p5 = scmp.ge.s32.totalorder %s1650_s23, 4   ;;  %s1907_s17 = smov %s1548_s18 }
 0xd19   : > { %s1908_s18 = smov %s1552_s19  ;;  %s1909_s19 = smov %s1661_s26 }
 0xd1a   : > { %s1910_s20 = smov %s1650_s23  ;;  %28 = sbr.rel (!%p26_p5) target bundleno = 9 (0x9), region = 123 }
 0xd21   :  { %1156 = vsyncpa [#allocation3], 1 }
 0xd22   :  { %1158 = vsyncpa [#allocation3 + $0x1], 1 }
 0xd23   :  { %1159 = vsyncpa [#allocation7], 1 }
 0xd24   :  { %1161 = vsyncpa [#allocation7 + $0x1], 1 }
 0xd25   :  { %1162 = vsyncpa [#allocation4], 1 }
 0xd26   :  { %1164 = vsyncpa [#allocation4 + $0x1], 1 }

</bundles_post_ra>
